<compile_context>
chip_gen: v5e
topology: v5e:2x2
jax: 0.10.0
libtpu: 0.0.40
codegen_flags: <defaults>
</compile_context>

<pallas_src>
import functools

import jax
import jax.numpy as jnp
from jax import lax
from jax.experimental import pallas as pl
from jax.experimental.pallas import tpu as pltpu

EPS = 1e-5
NEG_SLOPE = 0.2
_MIB = 1024 * 1024
# Per-sample VMEM budget below which the fully fused single-pass kernel is used.
_FUSED_VMEM_BUDGET = 40 * _MIB


def _vmem_limit(block_bytes):
    # Generous headroom, but stay well under v7x's 64 MiB physical VMEM.
    return int(min(56 * _MIB, max(block_bytes + 8 * _MIB, 16 * _MIB)))


# ----------------------------------------------------------------------------
# Kernel A (fused single pass, one sample per grid step):
#   conv (single tap-folded MXU matmul) + bias + GroupNorm + LeakyReLU
# ----------------------------------------------------------------------------
def _fused_conv_gn_lrelu_kernel(xc_ref, w_ref, b_ref, gamma_ref, beta_ref, o_ref,
                                *, c_per_group, num_groups, inv_denom):
    # xc_ref:    (1, K*K*Cin, P)  im2col'd activations (mxu dtype)
    # w_ref:     (Cout, K*K*Cin)  tap-folded conv weights (mxu dtype)
    # b_ref:     (Cout, 1) f32    conv bias
    # gamma_ref: (Cout, 1) f32    GroupNorm weight
    # beta_ref:  (Cout, 1) f32    GroupNorm bias
    # o_ref:     (1, Cout, P) f32 output (P lane-dense)
    y = jnp.dot(w_ref[...], xc_ref[0], preferred_element_type=jnp.float32)
    y = y + b_ref[...]                                    # (Cout, P) f32

    # GroupNorm statistics + folded affine per group (G, Cpg are compile-time ints).
    scales, shifts = [], []
    for g in range(num_groups):
        lo, hi = g * c_per_group, (g + 1) * c_per_group
        yg = y[lo:hi, :]
        mean = jnp.sum(yg) * inv_denom
        var = jnp.maximum(jnp.sum(yg * yg) * inv_denom - mean * mean, 0.0)
        inv_std = lax.rsqrt(var + EPS)
        sc = inv_std * gamma_ref[lo:hi, :]                # (Cpg, 1)
        sh = beta_ref[lo:hi, :] - mean * sc
        scales.append(sc)
        shifts.append(sh)
    scale = jnp.concatenate(scales, axis=0)               # (Cout, 1)
    shift = jnp.concatenate(shifts, axis=0)

    z = y * scale + shift
    o_ref[0] = jnp.maximum(z, NEG_SLOPE * z)


# ----------------------------------------------------------------------------
# Kernel B1 (tiled pass 1): conv + per-tile per-channel sum / sum-of-squares
# ----------------------------------------------------------------------------
def _conv_stats_kernel(xc_ref, w_ref, b_ref, y_ref, st_ref):
    # xc_ref: (1, K*K*Cin, Pt) mxu dtype; w_ref: (Cout, K*K*Cin); b_ref: (Cout, 1) f32
    # y_ref:  (1, Cout, Pt) f32 conv output tile
    # st_ref: (1, 1, Cout, 2) f32 per-tile per-channel [sum, sumsq]
    y = jnp.dot(w_ref[...], xc_ref[0], preferred_element_type=jnp.float32)
    y = y + b_ref[...]
    y_ref[0] = y
    st_ref[0, 0, :, 0:1] = jnp.sum(y, axis=1, keepdims=True)
    st_ref[0, 0, :, 1:2] = jnp.sum(y * y, axis=1, keepdims=True)


# ----------------------------------------------------------------------------
# Kernel B2 (tiled pass 2): folded GroupNorm affine + LeakyReLU
# ----------------------------------------------------------------------------
def _norm_lrelu_kernel(y_ref, scale_ref, shift_ref, o_ref):
    # y_ref: (1, Cout, Pt) f32; scale/shift: (1, Cout, 1) f32; o_ref: (1, Cout, Pt) f32
    z = y_ref[0] * scale_ref[0] + shift_ref[0]
    o_ref[0] = jnp.maximum(z, NEG_SLOPE * z)


# ----------------------------------------------------------------------------
# Wrapper helpers
# ----------------------------------------------------------------------------
def _im2col(x_nchw, ksize, pad, mxu_dtype):
    # (N, Cin, H, W) -> (N, K*K*Cin, P); tap index major (di*K+dj), channel minor.
    N, Cin, H, W = x_nchw.shape
    P = H * W
    x = x_nchw.astype(mxu_dtype)
    x_pad = jnp.pad(x, ((0, 0), (0, 0), (pad, pad), (pad, pad)))
    cols = []
    for di in range(ksize):
        for dj in range(ksize):
            cols.append(x_pad[:, :, di:di + H, dj:dj + W].reshape(N, Cin, P))
    return jnp.concatenate(cols, axis=1)


def _choose_spatial_tile(P, per_col_bytes, target_bytes):
    # Largest multiple of 128 that divides P and fits the per-block byte target.
    budget = max(128, target_bytes // max(per_col_bytes, 1))
    best, found = P, False
    cand = 128
    while cand <= min(P, budget):
        if P % cand == 0:
            best, found = cand, True
        cand += 128
    return best if found else P


# ----------------------------------------------------------------------------
# InBlock forward (NCHW in / NCHW out), use_norm=True, norm_type='group'
# ----------------------------------------------------------------------------
def in_block_forward(x_nchw, params, kernel_size=3, num_groups=2,
                     mxu_dtype=jnp.bfloat16, force_spatial_tiling=False,
                     spatial_tile_target_bytes=8 * _MIB):
    w, b = params["w"], params["b"]
    gamma, beta = params["gamma"], params["beta"]

    N, Cin, H, W = x_nchw.shape
    Cout = w.shape[0]
    K = kernel_size
    G = num_groups
    assert Cout % G == 0, "GroupNorm requires num_channels % num_groups == 0"
    Cpg = Cout // G
    pad = (K - 1) // 2
    Ho, Wo = H, W                       # stride 1, 'same' padding
    P = Ho * Wo
    KKC = K * K * Cin
    itemsize = jnp.dtype(mxu_dtype).itemsize

    # Wrapper-side im2col (halos baked in) + tap-folded weight matrix, both in MXU dtype.
    x_col = _im2col(x_nchw, K, pad, mxu_dtype)                               # (N, KKC, P)
    w_mat = jnp.transpose(w, (0, 2, 3, 1)).reshape(Cout, KKC).astype(mxu_dtype)
    b2 = b.reshape(Cout, 1).astype(jnp.float32)
    g2 = gamma.reshape(Cout, 1).astype(jnp.float32)
    be2 = beta.reshape(Cout, 1).astype(jnp.float32)

    # ---- path selection ------------------------------------------------------
    fused_block_bytes = (2 * (KKC * P * itemsize) + 2 * (Cout * P * 4)
                         + 2 * (Cout * KKC * itemsize + 3 * Cout * 4))
    can_tile = (P % 128 == 0)
    if force_spatial_tiling and can_tile:
        use_fused = False
    else:
        use_fused = (fused_block_bytes <= _FUSED_VMEM_BUDGET) or (not can_tile)

    if use_fused:
        # -------- fully fused single-pass kernel (one sample per grid step) --------
        kernel = functools.partial(
            _fused_conv_gn_lrelu_kernel,
            c_per_group=Cpg, num_groups=G, inv_denom=1.0 / float(Cpg * P))
        flops = 2 * N * Cout * KKC * P + 8 * N * Cout * P
        bytes_accessed = int(x_col.size * itemsize + w_mat.size * itemsize
                             + N * Cout * P * 4 + 3 * Cout * 4)
        out = pl.pallas_call(
            kernel,
            out_shape=jax.ShapeDtypeStruct((N, Cout, P), jnp.float32),
            grid=(N,),
            in_specs=[
                pl.BlockSpec((1, KKC, P), lambda n: (n, 0, 0)),
                pl.BlockSpec((Cout, KKC), lambda n: (0, 0)),
                pl.BlockSpec((Cout, 1), lambda n: (0, 0)),
                pl.BlockSpec((Cout, 1), lambda n: (0, 0)),
                pl.BlockSpec((Cout, 1), lambda n: (0, 0)),
            ],
            out_specs=pl.BlockSpec((1, Cout, P), lambda n: (n, 0, 0)),
            compiler_params=pltpu.CompilerParams(
                dimension_semantics=("parallel",),
                vmem_limit_bytes=_vmem_limit(fused_block_bytes)),
            cost_estimate=pl.CostEstimate(flops=flops, transcendentals=N * G,
                                          bytes_accessed=bytes_accessed),
        )(x_col, w_mat, b2, g2, be2)
        return out.reshape(N, Cout, Ho, Wo)

    # -------- spatially tiled two-pass path (large images / forced) --------
    per_col_bytes = 2 * (KKC * itemsize + Cout * 4)        # double-buffered in + out per column
    Pt = _choose_spatial_tile(P, per_col_bytes, spatial_tile_target_bytes)
    T = P // Pt

    # pass 1: conv + per-tile per-channel stats (both grid axes independent -> "parallel")
    conv_block_bytes = (2 * (KKC * Pt * itemsize) + 2 * (Cout * Pt * 4)
                        + 2 * (Cout * KKC * itemsize + Cout * 4) + 2 * (Cout * 2 * 4))
    y_conv, stats = pl.pallas_call(
        _conv_stats_kernel,
        out_shape=(jax.ShapeDtypeStruct((N, Cout, P), jnp.float32),
                   jax.ShapeDtypeStruct((N, T, Cout, 2), jnp.float32)),
        grid=(N, T),
        in_specs=[
            pl.BlockSpec((1, KKC, Pt), lambda n, t: (n, 0, t)),
            pl.BlockSpec((Cout, KKC), lambda n, t: (0, 0)),
            pl.BlockSpec((Cout, 1), lambda n, t: (0, 0)),
        ],
        out_specs=(
            pl.BlockSpec((1, Cout, Pt), lambda n, t: (n, 0, t)),
            pl.BlockSpec((1, 1, Cout, 2), lambda n, t: (n, t, 0, 0)),
        ),
        compiler_params=pltpu.CompilerParams(
            dimension_semantics=("parallel", "parallel"),
            vmem_limit_bytes=_vmem_limit(conv_block_bytes)),
        cost_estimate=pl.CostEstimate(
            flops=2 * N * Cout * KKC * P, transcendentals=0,
            bytes_accessed=int(x_col.size * itemsize + w_mat.size * itemsize
                               + N * Cout * P * 4)),
    )(x_col, w_mat, b2)

    # Tiny per-group reduction + affine fold in plain XLA (O(N*Cout) work).
    st = stats.sum(axis=1)                                  # (N, Cout, 2)
    denom = float(Cpg * P)
    sum_g = st[..., 0].reshape(N, G, Cpg).sum(-1)           # (N, G)
    sq_g = st[..., 1].reshape(N, G, Cpg).sum(-1)
    mean_g = sum_g / denom
    var_g = jnp.maximum(sq_g / denom - mean_g * mean_g, 0.0)
    inv_g = lax.rsqrt(var_g + EPS)
    mean_c = jnp.repeat(mean_g, Cpg, axis=1)                # (N, Cout)
    inv_c = jnp.repeat(inv_g, Cpg, axis=1)
    scale_c = (inv_c * gamma[None, :].astype(jnp.float32))[:, :, None]       # (N, Cout, 1)
    shift_c = beta[None, :, None].astype(jnp.float32) - mean_c[:, :, None] * scale_c

    # pass 2: normalization + LeakyReLU sweep (both grid axes "parallel")
    norm_block_bytes = 4 * (Cout * Pt * 4) + 4 * Cout * 4
    out = pl.pallas_call(
        _norm_lrelu_kernel,
        out_shape=jax.ShapeDtypeStruct((N, Cout, P), jnp.float32),
        grid=(N, T),
        in_specs=[
            pl.BlockSpec((1, Cout, Pt), lambda n, t: (n, 0, t)),
            pl.BlockSpec((1, Cout, 1), lambda n, t: (n, 0, 0)),
            pl.BlockSpec((1, Cout, 1), lambda n, t: (n, 0, 0)),
        ],
        out_specs=pl.BlockSpec((1, Cout, Pt), lambda n, t: (n, 0, t)),
        compiler_params=pltpu.CompilerParams(
            dimension_semantics=("parallel", "parallel"),
            vmem_limit_bytes=_vmem_limit(norm_block_bytes)),
        cost_estimate=pl.CostEstimate(
            flops=3 * N * Cout * P, transcendentals=0,
            bytes_accessed=int(2 * N * Cout * P * 4)),
    )(y_conv, scale_c, shift_c)
    return out.reshape(N, Cout, Ho, Wo)


# ----------------------------------------------------------------------------
# Pure-JAX reference (lax.conv) for verification
# ----------------------------------------------------------------------------
def _ref_groupnorm(x, gamma, beta, G):
    N, C, H, W = x.shape
    xg = x.reshape(N, G, C // G, H, W)
    mean = xg.mean(axis=(2, 3, 4), keepdims=True)
    var = ((xg - mean) ** 2).mean(axis=(2, 3, 4), keepdims=True)
    xn = ((xg - mean) / jnp.sqrt(var + EPS)).reshape(N, C, H, W)
    return xn * gamma[None, :, None, None] + beta[None, :, None, None]


def _ref_forward(x, params, kernel_size=3, num_groups=2):
    pad = (kernel_size - 1) // 2
    dn = ("NCHW", "OIHW", "NCHW")
    y = lax.conv_general_dilated(x, params["w"], (1, 1),
                                 [(pad, pad), (pad, pad)],
                                 dimension_numbers=dn)
    y = y + params["b"][None, :, None, None]
    y = _ref_groupnorm(y, params["gamma"], params["beta"], num_groups)
    return jnp.where(y > 0, y, NEG_SLOPE * y)


# ----------------------------------------------------------------------------
if __name__ == "__main__":
    key = jax.random.PRNGKey(0)
    N, in_ch, H, W = 2, 4, 16, 16
    out_ch, k, G = 8, 3, 2              # InBlock defaults: kernel_size=3, num_groups=2

    keys = jax.random.split(key, 3)
    fan = in_ch * k * k
    bound = 1.0 / (fan ** 0.5)
    params = {
        "w": jax.random.uniform(keys[0], (out_ch, in_ch, k, k), jnp.float32,
                                -bound, bound),
        "b": jax.random.uniform(keys[1], (out_ch,), jnp.float32, -bound, bound),
        "gamma": jnp.ones((out_ch,), jnp.float32),   # GroupNorm default init
        "beta": jnp.zeros((out_ch,), jnp.float32),
    }
    x = jax.random.normal(keys[2], (N, in_ch, H, W), jnp.float32)

    ref = jax.block_until_ready(_ref_forward(x, params, kernel_size=k, num_groups=G))

    # fused single-pass path (production default: bf16 MXU operands, f32 epilogue)
    out_bf16 = jax.block_until_ready(
        in_block_forward(x, params, kernel_size=k, num_groups=G))
    # semantics-check path: f32 MXU operands (tight tolerance vs. lax.conv reference)
    out_f32 = jax.block_until_ready(
        in_block_forward(x, params, kernel_size=k, num_groups=G,
                         mxu_dtype=jnp.float32))
    # spatially tiled two-pass path (forced, small tile target -> exercises T=2 tiles)
    out_tiled_f32 = jax.block_until_ready(
        in_block_forward(x, params, kernel_size=k, num_groups=G,
                         mxu_dtype=jnp.float32, force_spatial_tiling=True,
                         spatial_tile_target_bytes=16 * 1024))
    out_tiled_bf16 = jax.block_until_ready(
        in_block_forward(x, params, kernel_size=k, num_groups=G,
                         force_spatial_tiling=True,
                         spatial_tile_target_bytes=16 * 1024))

    assert out_bf16.shape == (N, out_ch, H, W), out_bf16.shape
    assert jnp.allclose(out_f32, ref, atol=2e-3, rtol=2e-3), float(
        jnp.max(jnp.abs(out_f32 - ref)))
    assert jnp.allclose(out_tiled_f32, ref, atol=2e-3, rtol=2e-3), float(
        jnp.max(jnp.abs(out_tiled_f32 - ref)))
    # bf16 MXU-operand rounding (~2^-8 relative) after normalization -> looser bound
    assert jnp.allclose(out_bf16, ref, atol=5e-2, rtol=5e-2), float(
        jnp.max(jnp.abs(out_bf16 - ref)))
    assert jnp.allclose(out_tiled_bf16, ref, atol=5e-2, rtol=5e-2), float(
        jnp.max(jnp.abs(out_tiled_bf16 - ref)))

    print("KERNEL_OK")
</pallas_src>

<mosaic_0001>
module attributes {stable_mosaic.version = 11 : i64} {
  func.func @_fused_conv_gn_lrelu_kernel(%arg0: i32, %arg1: memref<1x36x256xbf16, #tpu.memory_space<vmem>>, %arg2: memref<8x36xbf16, #tpu.memory_space<vmem>>, %arg3: memref<8x1xf32, #tpu.memory_space<vmem>>, %arg4: memref<8x1xf32, #tpu.memory_space<vmem>>, %arg5: memref<8x1xf32, #tpu.memory_space<vmem>>, %arg6: memref<1x8x256xf32, #tpu.memory_space<vmem>>) attributes {dimension_semantics = [#tpu.dimension_semantics<parallel>], iteration_bounds = array<i64: 2>, scalar_prefetch = 0 : i64, scratch_operands = 0 : i64, tpu.core_type = #tpu.core_type<tc>, window_params = [{transform_indices = @transform_0, window_bounds = array<i64: 1, 36, 256>}, {pipeline_mode = #tpu.pipeline_mode<synchronous>, transform_indices = @transform_1, window_bounds = array<i64: 8, 36>}, {pipeline_mode = #tpu.pipeline_mode<synchronous>, transform_indices = @transform_2, window_bounds = array<i64: 8, 1>}, {pipeline_mode = #tpu.pipeline_mode<synchronous>, transform_indices = @transform_3, window_bounds = array<i64: 8, 1>}, {pipeline_mode = #tpu.pipeline_mode<synchronous>, transform_indices = @transform_4, window_bounds = array<i64: 8, 1>}, {transform_indices = @transform_5, window_bounds = array<i64: 1, 8, 256>}]} {
    %c0 = arith.constant 0 : index
    %c0_0 = arith.constant 0 : index
    %0 = vector.load %arg2[%c0, %c0_0] : memref<8x36xbf16, #tpu.memory_space<vmem>>, vector<8x36xbf16>
    %c0_1 = arith.constant 0 : index
    %c0_2 = arith.constant 0 : index
    %c0_3 = arith.constant 0 : index
    %1 = vector.load %arg1[%c0_1, %c0_2, %c0_3] : memref<1x36x256xbf16, #tpu.memory_space<vmem>>, vector<1x36x256xbf16>
    %2 = vector.shape_cast %1 : vector<1x36x256xbf16> to vector<36x256xbf16>
    %cst = arith.constant dense<0.000000e+00> : vector<8x256xf32>
    %3 = tpu.matmul %0, %2, %cst {dimension_numbers = #tpu.dot_dimension_numbers<[1], [0], [0], [1], [0, 0, 1, 1], [], []>} : vector<8x36xbf16>, vector<36x256xbf16>, vector<8x256xf32> -> vector<8x256xf32>
    %c0_4 = arith.constant 0 : index
    %c0_5 = arith.constant 0 : index
    %4 = vector.load %arg3[%c0_4, %c0_5] : memref<8x1xf32, #tpu.memory_space<vmem>>, vector<8x1xf32>
    %5 = vector.broadcast %4 : vector<8x1xf32> to vector<8x256xf32>
    %6 = arith.addf %3, %5 : vector<8x256xf32>
    %7 = vector.extract_strided_slice %6 {offsets = [0, 0], sizes = [4, 256], strides = [1, 1]} : vector<8x256xf32> to vector<4x256xf32>
    %8 = vector.shape_cast %7 : vector<4x256xf32> to vector<1x4x256xf32>
    %cst_6 = arith.constant dense<0.000000e+00> : vector<1xf32>
    %9 = vector.multi_reduction <add>, %8, %cst_6 [1, 2] : vector<1x4x256xf32> to vector<1xf32>
    %10 = vector.shape_cast %9 : vector<1xf32> to vector<1x1x1xf32>
    %11 = vector.extract %10[0, 0, 0] : f32 from vector<1x1x1xf32>
    %cst_7 = arith.constant 9.765625E-4 : f32
    %12 = arith.mulf %11, %cst_7 : f32
    %13 = arith.mulf %7, %7 : vector<4x256xf32>
    %14 = vector.shape_cast %13 : vector<4x256xf32> to vector<1x4x256xf32>
    %cst_8 = arith.constant dense<0.000000e+00> : vector<1xf32>
    %15 = vector.multi_reduction <add>, %14, %cst_8 [1, 2] : vector<1x4x256xf32> to vector<1xf32>
    %16 = vector.shape_cast %15 : vector<1xf32> to vector<1x1x1xf32>
    %17 = vector.extract %16[0, 0, 0] : f32 from vector<1x1x1xf32>
    %cst_9 = arith.constant 9.765625E-4 : f32
    %18 = arith.mulf %17, %cst_9 : f32
    %19 = arith.mulf %12, %12 : f32
    %20 = arith.subf %18, %19 : f32
    %cst_10 = arith.constant 0.000000e+00 : f32
    %21 = arith.maximumf %20, %cst_10 : f32
    %cst_11 = arith.constant 9.99999974E-6 : f32
    %22 = arith.addf %21, %cst_11 : f32
    %23 = math.rsqrt %22 : f32
    %c0_12 = arith.constant 0 : index
    %c0_13 = arith.constant 0 : index
    %24 = vector.load %arg4[%c0_12, %c0_13] : memref<8x1xf32, #tpu.memory_space<vmem>>, vector<4x1xf32>
    %25 = vector.broadcast %23 : f32 to vector<4x1xf32>
    %26 = arith.mulf %25, %24 : vector<4x1xf32>
    %c0_14 = arith.constant 0 : index
    %c0_15 = arith.constant 0 : index
    %27 = vector.load %arg5[%c0_14, %c0_15] : memref<8x1xf32, #tpu.memory_space<vmem>>, vector<4x1xf32>
    %28 = vector.broadcast %12 : f32 to vector<4x1xf32>
    %29 = arith.mulf %28, %26 : vector<4x1xf32>
    %30 = arith.subf %27, %29 : vector<4x1xf32>
    %31 = vector.extract_strided_slice %6 {offsets = [4, 0], sizes = [4, 256], strides = [1, 1]} : vector<8x256xf32> to vector<4x256xf32>
    %32 = vector.shape_cast %31 : vector<4x256xf32> to vector<1x4x256xf32>
    %cst_16 = arith.constant dense<0.000000e+00> : vector<1xf32>
    %33 = vector.multi_reduction <add>, %32, %cst_16 [1, 2] : vector<1x4x256xf32> to vector<1xf32>
    %34 = vector.shape_cast %33 : vector<1xf32> to vector<1x1x1xf32>
    %35 = vector.extract %34[0, 0, 0] : f32 from vector<1x1x1xf32>
    %cst_17 = arith.constant 9.765625E-4 : f32
    %36 = arith.mulf %35, %cst_17 : f32
    %37 = arith.mulf %31, %31 : vector<4x256xf32>
    %38 = vector.shape_cast %37 : vector<4x256xf32> to vector<1x4x256xf32>
    %cst_18 = arith.constant dense<0.000000e+00> : vector<1xf32>
    %39 = vector.multi_reduction <add>, %38, %cst_18 [1, 2] : vector<1x4x256xf32> to vector<1xf32>
    %40 = vector.shape_cast %39 : vector<1xf32> to vector<1x1x1xf32>
    %41 = vector.extract %40[0, 0, 0] : f32 from vector<1x1x1xf32>
    %cst_19 = arith.constant 9.765625E-4 : f32
    %42 = arith.mulf %41, %cst_19 : f32
    %43 = arith.mulf %36, %36 : f32
    %44 = arith.subf %42, %43 : f32
    %cst_20 = arith.constant 0.000000e+00 : f32
    %45 = arith.maximumf %44, %cst_20 : f32
    %cst_21 = arith.constant 9.99999974E-6 : f32
    %46 = arith.addf %45, %cst_21 : f32
    %47 = math.rsqrt %46 : f32
    %c4 = arith.constant 4 : index
    %c0_22 = arith.constant 0 : index
    %48 = vector.load %arg4[%c4, %c0_22] : memref<8x1xf32, #tpu.memory_space<vmem>>, vector<4x1xf32>
    %49 = vector.broadcast %47 : f32 to vector<4x1xf32>
    %50 = arith.mulf %49, %48 : vector<4x1xf32>
    %c4_23 = arith.constant 4 : index
    %c0_24 = arith.constant 0 : index
    %51 = vector.load %arg5[%c4_23, %c0_24] : memref<8x1xf32, #tpu.memory_space<vmem>>, vector<4x1xf32>
    %52 = vector.broadcast %36 : f32 to vector<4x1xf32>
    %53 = arith.mulf %52, %50 : vector<4x1xf32>
    %54 = arith.subf %51, %53 : vector<4x1xf32>
    %55 = tpu.concatenate %26, %50 in 0 : vector<4x1xf32>, vector<4x1xf32> -> vector<8x1xf32>
    %56 = tpu.concatenate %30, %54 in 0 : vector<4x1xf32>, vector<4x1xf32> -> vector<8x1xf32>
    %57 = vector.broadcast %55 : vector<8x1xf32> to vector<8x256xf32>
    %58 = arith.mulf %6, %57 : vector<8x256xf32>
    %59 = vector.broadcast %56 : vector<8x1xf32> to vector<8x256xf32>
    %60 = arith.addf %58, %59 : vector<8x256xf32>
    %cst_25 = arith.constant 2.000000e-01 : f32
    %61 = vector.broadcast %cst_25 : f32 to vector<8x256xf32>
    %62 = arith.mulf %61, %60 : vector<8x256xf32>
    %63 = arith.maximumf %60, %62 : vector<8x256xf32>
    %c0_26 = arith.constant 0 : index
    %c0_27 = arith.constant 0 : index
    %c0_28 = arith.constant 0 : index
    %64 = vector.load %arg6[%c0_26, %c0_27, %c0_28] : memref<1x8x256xf32, #tpu.memory_space<vmem>>, vector<1x8x256xf32>
    %65 = vector.shape_cast %64 : vector<1x8x256xf32> to vector<8x256xf32>
    %66 = vector.shape_cast %63 : vector<8x256xf32> to vector<1x8x256xf32>
    tpu.vector_store %arg6[%c0_26, %c0_27, %c0_28], %66 {strides = array<i32>} : memref<1x8x256xf32, #tpu.memory_space<vmem>>, vector<1x8x256xf32>,
    return
  }
  func.func @transform_0(%arg0: i32) -> (i32, i32, i32) {
    %c0_i32 = arith.constant 0 : i32
    %c0_i32_0 = arith.constant 0 : i32
    %c0_i32_1 = arith.constant 0 : i32
    return %arg0, %c0_i32, %c0_i32_0 : i32, i32, i32
  }
  func.func @transform_1(%arg0: i32) -> (i32, i32) {
    %c0_i32 = arith.constant 0 : i32
    %c0_i32_0 = arith.constant 0 : i32
    %c0_i32_1 = arith.constant 0 : i32
    return %c0_i32, %c0_i32_0 : i32, i32
  }
  func.func @transform_2(%arg0: i32) -> (i32, i32) {
    %c0_i32 = arith.constant 0 : i32
    %c0_i32_0 = arith.constant 0 : i32
    %c0_i32_1 = arith.constant 0 : i32
    return %c0_i32, %c0_i32_0 : i32, i32
  }
  func.func @transform_3(%arg0: i32) -> (i32, i32) {
    %c0_i32 = arith.constant 0 : i32
    %c0_i32_0 = arith.constant 0 : i32
    %c0_i32_1 = arith.constant 0 : i32
    return %c0_i32, %c0_i32_0 : i32, i32
  }
  func.func @transform_4(%arg0: i32) -> (i32, i32) {
    %c0_i32 = arith.constant 0 : i32
    %c0_i32_0 = arith.constant 0 : i32
    %c0_i32_1 = arith.constant 0 : i32
    return %c0_i32, %c0_i32_0 : i32, i32
  }
  func.func @transform_5(%arg0: i32) -> (i32, i32, i32) {
    %c0_i32 = arith.constant 0 : i32
    %c0_i32_0 = arith.constant 0 : i32
    %c0_i32_1 = arith.constant 0 : i32
    return %arg0, %c0_i32, %c0_i32_0 : i32, i32, i32
  }
}

</mosaic_0001>

<bundles_post_ra>
// kernel: tpu_custom_call.1
= control target key start
LH: loop header
LB: loop body
LE: loop exit
PB: predicated region body
PF: predicated region fallthrough
CT: control target
= control target key end

     0   :  { %10 = vsyncpa [#allocation3], 0  ;;  %s840_s0 = inlined_call_operand.vmem [shape: bf16[2,36,256], index: 0, kind: input, shape index: {}]   ;;  %s841_s1 = inlined_call_operand.vmem [shape: bf16[8,36], index: 1, kind: input, shape index: {}]   ;;  %s842_s2 = inlined_call_operand.vmem [shape: f32[8,1], index: 2, kind: input, shape index: {}]   ;;  %s843_s3 = inlined_call_operand.vmem [shape: f32[8,1], index: 3, kind: input, shape index: {}]   ;;  %s844_s4 = inlined_call_operand.vmem [shape: f32[8,1], index: 4, kind: input, shape index: {}]   ;;  %s845_s5 = inlined_call_operand.hbm [shape: f32[2,8,256], index: 5, kind: output, shape index: {}]  }
   0x1   :  { %12 = vsyncpa [#allocation3 + $0x1], 0  ;;  %s706_s18 = smov 0   ;;  %s708_s19 = smov 0  }
   0x2   :  { %s710_s20 = smov 0   ;;  %s712_s21 = smov 0  }
   0x3 LB: > { %s727_s22 = sadd.s32 4294967295, %s672_s21   ;;  %s515_s23 = sadd.s32 4294967294, %s672_s21   ;;  %s672_s21 = sphi %s712_s21, %s851_s21   ;;  %s668_s20 = sphi %s710_s20, %s850_s20   ;;  %s664_s19 = sphi %s708_s19, %s849_s19   ;;  %s660_s18 = sphi %s706_s18, %s848_s18  }
   0x4   : > { %s731_s24 = sadd.s32 1, %s672_s21   ;;  %s135_s25 = sadd.s32 1, %s668_s20 }
   0x5   : > { %s132_s26 = ssub.s32 %s672_s21, %s731_s24  ;;  %p145_p0 = scmp.ne.s32.totalorder %s668_s20, %s664_s19 }
   0x6   : > { %p133_p1 = scmp.eq.s32.totalorder %s132_s26, 0  ;;  %p146_p2 = scmp.eq.s32.totalorder %s727_s22, 1 }
   0x7   : > { %p151_p3 = scmp.ne.s32.totalorder %s664_s19, %s660_s18  ;;  %p152_p4 = scmp.eq.s32.totalorder %s515_s23, 1 }
   0x8   : > { %s742_s27 = scalar_select %p133_p1, %s668_s20, %s135_s25  }
   0x9   : > { %p744_p5 = por %p146_p2, %p145_p0  ;;  %p748_p6 = por %p152_p4, %p151_p3 }
   0xa   : > { %p518_p7 = scmp.ge.s32.totalorder %s672_s21, 1  ;;  %p190_p8 = scmp.lt.s32.totalorder %s672_s21, 3 }
   0xc   : > { %p191_p9 = pnand %p518_p7, %p190_p8 }
   0xd   : > { %p218_p10 = scmp.lt.s32.totalorder (!%p191_p9), %s727_s22, 1  ;;  %s675_s26 = smov (!%p191_p9), 0.0  }
   0xe   : > { %194 = sbr.rel (%p191_p9) target bundleno = 643 (0x283), region = 40 }
  0x13   : > { %v674_v0 = vmov 0   ;;  %v230_v1 = vld [vmem:[%s842_s2] sm:$0xff]  ;;  %s219_s7 = scalar_select %p218_p10, %s727_s22, 1  ;;  %vm265_vm0 = vcmask 1041408   ;;  %vm261_vm1 = vcmask 293888   ;;  %vm298_vm2 = vcmask 1043456  }
  0x14   : > { %603 = vset.pattern.permute.xlu0 %v674_v0  ;;  %604 = vset.pattern.permute.xlu2 %v674_v0  ;;  %v224_v21 = vld [vmem:[%s841_s1] sm:$0xf] }
  0x15   : > { %233 = vperm.xlu0 %603, %v230_v1   ;;  %605 = vset.pattern.permute.xlu1 %v674_v0  ;;  %s549_s8 = smul.u32 40, %s219_s7 }
  0x17   : > { %s222_s11 = scalar_lea.vmem %s840_s0, %s549_s8 }
  0x18   : > { %v229_v2 = vld [vmem:[%s222_s11 + $0x20] sm:$0x33]  ;;  %v531_v5 = vld [vmem:[%s222_s11 + $0x10] sm:$0xf]  ;;  %v547_v8 = vld [vmem:[%s222_s11 + $0x14] sm:$0xf0] }
  0x19   : > { %v249_v3 = vunpack.c.l.b16 %v229_v2  ;;  %v250_v4 = vunpack.c.h.b16 %v229_v2  ;;  %v546_v9 = vld [vmem:[%s222_s11 + $0x14] sm:$0xf]  ;;  %v533_v10 = vld [vmem:[%s222_s11 + $0x18] sm:$0xf0]  ;;  %v532_v13 = vor.u32 %v547_v8, %v531_v5  ;;  %v523_v15 = vld [vmem:[%s222_s11] sm:$0xf] }
  0x1a   : > { %v536_v14 = vor.u32 %v546_v9, %v533_v10  ;;  %v545_v16 = vld [vmem:[%s222_s11 + $0x4] sm:$0xf0]  ;;  %v544_v17 = vld [vmem:[%s222_s11 + $0x4] sm:$0xf]  ;;  %v525_v18 = vld [vmem:[%s222_s11 + $0x8] sm:$0xf0] }
  0x1b   : > { %v255_v6 = vpack.c.b16 %v249_v3, %v249_v3  ;;  %v256_v7 = vpack.c.b16 %v250_v4, %v250_v4  ;;  %v524_v19 = vor.u32 %v545_v16, %v523_v15  ;;  %v528_v20 = vor.u32 %v544_v17, %v525_v18 }
  0x1d   : > { %v267_v11 = vsel %vm265_vm0, %v255_v6, 0  ;;  %v270_v12 = vsel %vm265_vm0, %v256_v7, 0 }
  0x1e   : > { %277 = vmatpush.bf16.msra.mxu0 %v267_v11  ;;  %290 = vmatpush.bf16.msra.mxu1 %v270_v12 }
  0x22   : > { %278 = vmatpush.bf16.msra.mxu0 %v532_v13  ;;  %291 = vmatpush.bf16.msra.mxu1 %v536_v14 }
  0x26   : > { %279 = vmatpush.bf16.msra.mxu0 %v524_v19  ;;  %292 = vmatpush.bf16.msra.mxu1 %v528_v20  ;;  %v343_v19 = vld [vmem:[%s843_s3] sm:$0xf] }
  0x29   : > { %537 = vmatmul.msk.bf16.vlgmr.msra.gmra.mxu0 %vm261_vm1, %v224_v21  ;;  %538 = vmatmul.msk.bf16.vlgmr.msra.gmra.mxu1 %vm261_vm1, %v224_v21 }
  0x87   : > { %v234_v22 = vpop.permute.xlu0 %233 }
  0xa6   : > { %v281_v23 = vpop.f32.mrf.mxu0  ;;  %v294_v24 = vpop.f32.mrf.mxu1 }
  0xa7   : > { %v765_v25 = vadd.f32 %v281_v23, %v234_v22  ;;  %v767_v26 = vadd.f32 %v294_v24, %v234_v22 }
  0xa9   : > { %v299_v27 = vsel %vm298_vm2, %v765_v25, 0.0  ;;  %v300_v28 = vsel %vm298_vm2, %v767_v26, 0.0  ;;  %v312_v29 = vmul.f32 %v765_v25, %v765_v25  ;;  %v313_v30 = vmul.f32 %v767_v26, %v767_v26 }
  0xaa   : > { %v301_v31 = vadd.f32 %v300_v28, %v299_v27  ;;  %v352_v39 = vrot.slane %v765_v25, 4  ;;  %v353_v40 = vrot.slane %v767_v26, 4 }
  0xab   : > { %v314_v32 = vsel %vm298_vm2, %v312_v29, 0.0  ;;  %v315_v33 = vsel %vm298_vm2, %v313_v30, 0.0  ;;  %v371_v34 = vrot.slane %v312_v29, 4  ;;  %v372_v35 = vrot.slane %v313_v30, 4 }
  0xac   : > { %302 = vadd.xlane.f32.xlu0 %v301_v31  ;;  %v316_v36 = vadd.f32 %v315_v33, %v314_v32  ;;  %v356_v44 = vsel %vm298_vm2, %v352_v39, 0.0  ;;  %v357_v45 = vsel %vm298_vm2, %v353_v40, 0.0 }
  0xad   : > { %v375_v37 = vsel %vm298_vm2, %v371_v34, 0.0  ;;  %v376_v38 = vsel %vm298_vm2, %v372_v35, 0.0  ;;  %v358_v46 = vadd.f32 %v357_v45, %v356_v44  ;;  %v404_v34 = vld [vmem:[%s843_s3 + $0x4] sm:$0xf] }
  0xae   : > { %v283_v41 = vpop.f32.mrf.mxu0  ;;  %v296_v42 = vpop.f32.mrf.mxu1  ;;  %317 = vadd.xlane.f32.xlu1 %v316_v36  ;;  %v377_v43 = vadd.f32 %v376_v38, %v375_v37  ;;  %v407_v38 = vld [vmem:[%s844_s4 + $0x4] sm:$0xf] }
  0xaf   : > { %v346_v41 = vld [vmem:[%s844_s4] sm:$0xf] }
  0xb0   : > { %378 = vadd.xlane.f32.xlu2 %v377_v43 }
  0xb6   : > { %359 = vadd.xlane.f32.xlu1 %v358_v46 }
 0x11f   : > { %v303_v47 = vpop.xlane.xlu0 %302 }
 0x120   : > { %v304_v48 = vrot.slane %v303_v47, 4 }
 0x121   : > { %v318_v49 = vpop.xlane.xlu1 %317 }
 0x122   : > { %v305_v50 = vadd.f32 %v304_v48, %v303_v47  ;;  %v319_v51 = vrot.slane %v318_v49, 4 }
 0x123   : > { %v379_v62 = vpop.xlane.xlu2 %378 }
 0x124   : > { %v306_v52 = vrot.slane %v305_v50, 2  ;;  %v320_v53 = vadd.f32 %v319_v51, %v318_v49  ;;  %v380_v0 = vrot.slane %v379_v62, 4 }
 0x126   : > { %v321_v54 = vrot.slane %v320_v53, 2  ;;  %v307_v55 = vadd.f32 %v306_v52, %v305_v50  ;;  %v381_v3 = vadd.f32 %v380_v0, %v379_v62 }
 0x128   : > { %v308_v56 = vrot.slane %v307_v55, 1  ;;  %v322_v57 = vadd.f32 %v321_v54, %v320_v53  ;;  %v382_v6 = vrot.slane %v381_v3, 2 }
 0x129   : > { %v360_v61 = vpop.xlane.xlu1 %359 }
 0x12a   : > { %v309_v58 = vadd.f32 %v308_v56, %v307_v55  ;;  %v323_v59 = vrot.slane %v322_v57, 1  ;;  %v361_v63 = vrot.slane %v360_v61, 4  ;;  %v383_v10 = vadd.f32 %v382_v6, %v381_v3 }
 0x12c   : > { %550 = vpush %v309_v58  ;;  %v324_v60 = vadd.f32 %v323_v59, %v322_v57  ;;  %v362_v2 = vadd.f32 %v361_v63, %v360_v61  ;;  %v384_v14 = vrot.slane %v383_v10, 1 }
 0x12e   : > { %552 = vpush %v324_v60  ;;  %v363_v4 = vrot.slane %v362_v2, 2  ;;  %v385_v18 = vadd.f32 %v384_v14, %v383_v10 }
 0x130   : > { %v364_v9 = vadd.f32 %v363_v4, %v362_v2 }
 0x132   : > { %v365_v13 = vrot.slane %v364_v9, 1 }
 0x134   : > { %v366_v17 = vadd.f32 %v365_v13, %v364_v9 }
 0x15d   : > { %s551_s14 = spop %550 }
 0x15e   : > { %s785_s15 = smul.f32 0.0009765625, %s551_s14 }
 0x15f   : > { %s553_s16 = spop %552 }
 0x160   : > { %s327_s17 = smul.f32 %s785_s15, %s785_s15  ;;  %v347_v22 = vstv %s785_s15 }
 0x161   : > { %s326_s23 = smul.f32 0.0009765625, %s553_s16 }
 0x163   : > { %s328_s25 = ssub.f32 %s326_s23, %s327_s17 }
 0x165   : > { %s329_s30 = smax.f32 %s675_s26, %s328_s25 }
 0x166   : > { %s330_s6 = sadd.f32 1e-05, %s329_s30 }
 0x168   : > { %v331_v1 = vstv %s330_s6  ;;  %s630_s6 = scalar_lea.hbm %s845_s5, 32 }
 0x169   : > { %606 = vrsqrt.f32 %v331_v1  ;;  %vm338_vm4 = vweird.f32 %v331_v1 }
 0x16f   : > { %v607_v5 = vpop.eup %606 }
 0x170   : > { %v333_v7 = vmul.f32 %v607_v5, %v331_v1  ;;  %vm339_vm3 = vweird.f32 %v607_v5 }
 0x171   : > { %vm340_vm5 = vmor %vm338_vm4, %vm339_vm3 }
 0x172   : > { %v334_v8 = vmul.f32 %v607_v5, %v333_v7 }
 0x174   : > { %v335_v11 = vmul.f32 0.5, %v334_v8 }
 0x176   : > { %v336_v12 = vsub.f32 1.5, %v335_v11 }
 0x178   : > { %v337_v15 = vmul.f32 %v607_v5, %v336_v12 }
 0x17a   : > { %v341_v16 = vsel %vm340_vm5, %v607_v5, %v337_v15 }
 0x17b   : > { %554 = vpush %v341_v16 }
 0x17c   : > { %556 = vpush %v366_v17 }
 0x17d   : > { %558 = vpush %v385_v18 }
 0x1ac   : > { %s555_s9 = spop %554 }
 0x1ad   : > { %v344_v20 = vstv %s555_s9  ;;  %s557_s10 = spop %556  ;;  %s215_s9 = sand.u32 1, %s664_s19  }
 0x1ae   : > { %v345_v21 = vmul.f32 %v344_v20, %v343_v19  ;;  %s368_s11 = smul.f32 0.0009765625, %s557_s10  ;;  %s559_s12 = spop %558 }
 0x1af   : > { %s387_s13 = smul.f32 0.0009765625, %s559_s12  ;;  %s519_s10 = sshll.u32 %s215_s9, 4 }
 0x1b0   : > { %v348_v23 = vmul.f32 %v347_v22, %v345_v21  ;;  %s388_s14 = smul.f32 %s368_s11, %s368_s11  ;;  %v408_v37 = vstv %s368_s11  ;;  %s548_s11 = sshll.u32 %s727_s22, 4 }
 0x1b1   : > { %s440_s22 = scalar_lea.sflag [#allocation3], %s215_s9 }
 0x1b2   : > { %s389_s16 = ssub.f32 %s387_s13, %s388_s14  ;;  %v349_v44 = vsub.f32 %v346_v41, %v348_v23  ;;  %s451_s14 = scalar_lea.hbm %s845_s5, %s548_s11 }
 0x1b4   : > { %s390_s17 = smax.f32 %s675_s26, %s389_s16  ;;  %s217_s16 = scalar_lea.vmem [#allocation2], %s519_s10 }
 0x1b5   : > { %s391_s23 = sadd.f32 1e-05, %s390_s17  ;;  %s453_s17 = sshll.u32 %s217_s16, 4  ;;  %s454_s17 = int_to_ptr.vmem [resolvable:$true] %s453_s17 }
 0x1b7   : > { %v392_v24 = vstv %s391_s23  ;;  %s455_s23 = sshll.u32 %s451_s14, 4  ;;  %s456_s23 = int_to_ptr.hbm [resolvable:$true] %s455_s23 }
 0x1b8   : > { %608 = vrsqrt.f32 %v392_v24  ;;  %vm399_vm7 = vweird.f32 %v392_v24  ;;  %s624_s15 = sshra.s32 %s456_s23, 4  ;;  %s625_s15 = int_to_ptr.hbm [resolvable:$true] %s624_s15 }
 0x1b9   : > { %s626_s25 = scalar_lea.hbm %s625_s15, 16  ;;  %p631_p0 = scmp.lt.s32.totalorder %s625_s15, %s845_s5 }
 0x1ba   : > { %p627_p11 = scmp.ne.s32.totalorder %s625_s15, %s626_s25  ;;  %p632_p1 = scmp.lt.s32.totalorder %s630_s6, %s626_s25 }
 0x1bc   : > { %p628_p12 = pnand %p627_p11, %p744_p5  ;;  %p633_p2 = por %p632_p1, %p631_p0 }
 0x1be   : > { %v609_v27 = vpop.eup %608  ;;  %p629_p13 = pneg %p628_p12 }
 0x1bf   : > { %v394_v28 = vmul.f32 %v609_v27, %v392_v24  ;;  %vm400_vm6 = vweird.f32 %v609_v27 }
 0x1c0   : > { %vm401_vm8 = vmor %vm399_vm7, %vm400_vm6  ;;  %p634_p3 = pnand %p633_p2, %p629_p13 }
 0x1c1   : > { %v395_v29 = vmul.f32 %v609_v27, %v394_v28 }
 0x1c3   : > { %v396_v30 = vmul.f32 0.5, %v395_v29 }
 0x1c5   : > { %v397_v31 = vsub.f32 1.5, %v396_v30 }
 0x1c7   : > { %v398_v32 = vmul.f32 %v609_v27, %v397_v31 }
 0x1c9   : > { %v402_v33 = vsel %vm401_vm8, %v609_v27, %v398_v32 }
 0x1ca   : > { %560 = vpush %v402_v33 }
 0x1fb   : > { %s561_s26 = spop %560 }
 0x1fc   : > { %v405_v35 = vstv %s561_s26 }
 0x1fd   : > { %v406_v36 = vmul.f32 %v405_v35, %v404_v34 }
 0x1ff   : > { %v409_v39 = vmul.f32 %v408_v37, %v406_v36  ;;  %v412_v40 = vrot.slane %v406_v36, 4 }
 0x201   : > { %v410_v42 = vsub.f32 %v407_v38, %v409_v39  ;;  %v414_v43 = vsel %vm298_vm2, %v345_v21, %v412_v40 }
 0x202   : > { %421 = vperm.xlu2 %604, %v414_v43  }
 0x203   : > { %v416_v45 = vrot.slane %v410_v42, 4 }
 0x205   : > { %v418_v46 = vsel %vm298_vm2, %v349_v44, %v416_v45 }
 0x206   : > { %428 = vperm.xlu1 %605, %v418_v46  }
 0x25c   : > { %v422_v47 = vpop.permute.xlu2 %421 }
 0x25d   : > { %v424_v48 = vmul.f32 %v422_v47, %v765_v25  ;;  %v425_v49 = vmul.f32 %v422_v47, %v767_v26 }
 0x278   : > { %v429_v50 = vpop.permute.xlu1 %428 }
 0x279   : > { %v431_v51 = vadd.f32 %v429_v50, %v424_v48  ;;  %v432_v52 = vadd.f32 %v429_v50, %v425_v49 }
 0x27b   : > { %v433_v53 = vmul.f32 0.2, %v431_v51  ;;  %v434_v54 = vmul.f32 0.2, %v432_v52 }
 0x27d   : > { %v435_v55 = vmax.f32 %v431_v51, %v433_v53  ;;  %v436_v56 = vmax.f32 %v432_v52, %v434_v54 }
 0x27f   : > { %437 = vst [vmem:[%s217_s16] sm:$0xff] %v435_v55 }
 0x280   : > { %438 = vst [vmem:[%s217_s16 + $0x8] sm:$0xff] %v436_v56 }
 0x281   : > { %637 = shalt.err (!%p634_p3)
}
 0x282   : > { %562 = dma.vmem_to_hbm [thread:$0]  (%p744_p5), %s454_s17, 256, %s456_s23, %s440_s22  }
 0x283 PF: > { %p568_p4 = scmp.ge.s32.totalorder %s672_s21, 2  ;;  %s467_s9 = sand.u32 1, %s660_s18  }
 0x284   : > { %s468_s10 = scalar_lea.sflag [#allocation3], %s467_s9 }
 0x285   : > { %p565_p7 = pnand %p568_p4, %p748_p6 }
 0x287   : > { %p566_p8 = pneg %p565_p7 }
 0x289   : > { %655 = dma.done.wait (%p566_p8), %s468_s10, 256  }
 0x28a   : > { %657 = vsyncadd (%p566_p8), %s468_s10, 4294967040  ;;  %p15_p9 = scmp.ge.s32.totalorder %s731_s24, 4   ;;  %s848_s18 = smov %s664_s19 }
 0x28b   : > { %s849_s19 = smov %s668_s20  ;;  %s850_s20 = smov %s742_s27 }
 0x28c   : > { %s851_s21 = smov %s731_s24  ;;  %17 = sbr.rel (!%p15_p9) target bundleno = 3 (0x3), region = 75 }
 0x291   :  { %474 = vsyncpa [#allocation3], 1 }
 0x292   :  { %476 = vsyncpa [#allocation3 + $0x1], 1 }

</bundles_post_ra>
